<compile_context>
chip_gen: v6e
topology: v6e:2x2x1
jax: 0.10.0
libtpu: 0.0.40
codegen_flags: <defaults>
</compile_context>

<pallas_src>
import functools

import jax
import jax.numpy as jnp
import numpy as np
from jax import lax
from jax.experimental import pallas as pl
from jax.experimental.pallas import tpu as pltpu

KH, KW = 2, 2      # Conv2d kernel size in the module is 2 (despite the class name "conv3x3")
BN_EPS = 1e-5


def _round_up(v, m):
    return (v + m - 1) // m * m


def _fused_conv_bn_relu_kernel(x_ref, w_ref, gb_ref, out_ref,
                               xt_ref, y_ref, stats_ref, sc_ref,
                               *, W, OW, L, L_pad, NBPB, C_in_pad, inv_count):
    """Grid = (phase, batch_block).

    phase 0: build the stacked conv operand, one MXU matmul, masked per-channel stats,
             park raw conv output in the resident y scratch.
    phase 1: (block 0) fold stats + gamma/beta into scale/shift, then per block apply
             scale/shift + ReLU and store the lane-dense output block.
    """
    phase = pl.program_id(0)
    blk = pl.program_id(1)
    BL = NBPB * L_pad

    @pl.when(jnp.logical_and(phase == 0, blk == 0))
    def _init():
        stats_ref[...] = jnp.zeros_like(stats_ref)

    @pl.when(phase == 0)
    def _conv_and_stats():
        # Stacked operand: all KH*KW taps and all NBPB images of this block go into one
        # (KH*KW*C_in_pad, NBPB*L_pad) RHS so the conv is a single matmul (bigger K, bigger N).
        for i in range(NBPB):
            for di in range(KH):
                for dj in range(KW):
                    t = di * KW + dj
                    s = di * W + dj
                    xt_ref[t * C_in_pad:(t + 1) * C_in_pad,
                           i * L_pad:(i + 1) * L_pad] = x_ref[i, :, s:s + L_pad]

        y = jnp.dot(w_ref[...], xt_ref[...],
                    preferred_element_type=jnp.float32)        # (C_out_pad, NBPB*L_pad) f32

        # Per-channel sum / sum-of-squares over valid output columns only (mask out the
        # wrapped columns (p % W) >= OW and the lane padding p >= L).
        col = lax.broadcasted_iota(jnp.int32, (1, BL), 1) % L_pad
        valid = jnp.logical_and(col < L, (col % W) < OW)
        y0 = jnp.where(valid, y, 0.0)
        s0 = jnp.sum(y0, axis=1, keepdims=True)
        s1 = jnp.sum(y0 * y0, axis=1, keepdims=True)
        stats_ref[...] += jnp.concatenate([s0, s1], axis=1)     # (C_out_pad, 2) accumulator

        # Park the raw conv output; phase 1 re-reads it instead of recomputing the conv.
        start = pl.multiple_of(blk * BL, 128)
        y_ref[:, pl.ds(start, BL)] = y

    @pl.when(jnp.logical_and(phase == 1, blk == 0))
    def _fold_bn():
        s = stats_ref[...]
        mean = s[:, 0:1] * inv_count
        var = s[:, 1:2] * inv_count - mean * mean               # biased variance (BN training)
        rstd = lax.rsqrt(var + BN_EPS)
        scale = gb_ref[:, 0:1] * rstd                           # gamma * rstd
        shift = gb_ref[:, 1:2] - mean * scale                   # beta - mean * gamma * rstd
        sc_ref[...] = jnp.concatenate([scale, shift], axis=1)

    @pl.when(phase == 1)
    def _bn_relu_store():
        start = pl.multiple_of(blk * BL, 128)
        y = y_ref[:, pl.ds(start, BL)]
        z = jnp.maximum(y * sc_ref[:, 0:1] + sc_ref[:, 1:2], 0.0)
        for i in range(NBPB):
            out_ref[i, :, :] = z[:, i * L_pad:(i + 1) * L_pad].astype(out_ref.dtype)


@functools.partial(jax.jit, static_argnames=("op_dtype",))
def conv3x3_forward(x, weight, bias, gamma, beta, op_dtype=jnp.bfloat16):
    """PyTorch-equivalent forward of `conv3x3` (Conv2d(k=2) -> BN(train) -> ReLU).

    x:      (N, C_in, H, W)       float32 (NCHW)
    weight: (C_out, C_in, KH, KW) float32 (PyTorch Conv2d layout)
    bias:   (C_out,)              accepted for API parity; exactly cancelled by BN mean sub.
    gamma, beta: (C_out,)         BatchNorm2d affine parameters
    op_dtype: matmul operand dtype (bf16 default; accumulation is always f32)
    returns (N, C_out, OH, OW)    float32 (NCHW)
    """
    del bias  # bias before training-mode BatchNorm is exactly cancelled -> skip the work.

    N, C_in, H, W = x.shape
    C_out = weight.shape[0]
    OH, OW = H - KH + 1, W - KW + 1

    L = OH * W                                   # flat output row-stride per image
    L_pad = _round_up(L, 128)                    # lane-dense output width
    tap_max = (KH - 1) * W + (KW - 1)            # largest shifted-slice start offset
    SP_pad = _round_up(max(H * W, tap_max + L_pad), 128)
    C_in_pad = _round_up(C_in, 8)                # sublane-aligned tap groups
    C_out_pad = _round_up(C_out, 8)
    K_stack = KH * KW * C_in_pad                 # fused contraction dim of the single matmul

    # Images per grid block: stack the whole (small) batch on lanes when cheap, else one
    # image per block.  (Either choice divides N.)
    NBPB = N if N * L_pad <= 4096 else 1
    NB = N // NBPB
    BL = NBPB * L_pad

    # Lane-dense, zero-padded input slab (N, C_in_pad, SP_pad); pad region is never "valid".
    x_flat = x.reshape(N, C_in, H * W)
    x_flat = jnp.pad(x_flat, ((0, 0), (0, C_in_pad - C_in), (0, SP_pad - H * W)))
    x_flat = x_flat.astype(op_dtype)

    # Stacked weights: W_stk[o, t*C_in_pad + c] = weight[o, c, di, dj] with t = di*KW + dj.
    wt = jnp.transpose(weight, (2, 3, 1, 0))                       # (KH, KW, C_in, C_out)
    wt = jnp.pad(wt, ((0, 0), (0, 0), (0, C_in_pad - C_in), (0, C_out_pad - C_out)))
    wt = wt.reshape(K_stack, C_out_pad).T.astype(op_dtype)          # (C_out_pad, K_stack)

    # gamma/beta merged into a single (C_out_pad, 2) input (one DMA stream instead of two).
    gb = jnp.stack([jnp.pad(gamma, (0, C_out_pad - C_out)),
                    jnp.pad(beta, (0, C_out_pad - C_out))], axis=1).astype(jnp.float32)

    inv_count = 1.0 / float(N * OH * OW)
    op_bytes = np.dtype(op_dtype).itemsize
    flops = 2 * C_out_pad * K_stack * N * L_pad + 4 * C_out_pad * N * L_pad
    bytes_accessed = (x_flat.size * op_bytes + wt.size * op_bytes + gb.size * 4
                      + N * C_out_pad * L_pad * 4)

    kern = functools.partial(
        _fused_conv_bn_relu_kernel,
        W=W, OW=OW, L=L, L_pad=L_pad, NBPB=NBPB, C_in_pad=C_in_pad, inv_count=inv_count)

    out_padded = pl.pallas_call(
        kern,
        out_shape=jax.ShapeDtypeStruct((N, C_out_pad, L_pad), jnp.float32),
        grid_spec=pltpu.PrefetchScalarGridSpec(
            num_scalar_prefetch=0,
            grid=(2, NB),                                   # (phase, batch-block)
            in_specs=[
                # x only needed in phase 0; phase 1 parks the index at block 0 (no re-DMA).
                pl.BlockSpec((NBPB, C_in_pad, SP_pad), lambda p, b: (b * (1 - p), 0, 0)),
                pl.BlockSpec((C_out_pad, K_stack), lambda p, b: (0, 0)),   # resident weights
                pl.BlockSpec((C_out_pad, 2), lambda p, b: (0, 0)),         # resident gamma/beta
            ],
            # Phase 0 never writes the output; keeping its index parked at block 0 means no
            # block is flushed before its phase-1 data has been written.
            out_specs=pl.BlockSpec((NBPB, C_out_pad, L_pad), lambda p, b: (b * p, 0, 0)),
            scratch_shapes=[
                pltpu.VMEM((K_stack, BL), op_dtype),                 # stacked matmul operand
                pltpu.VMEM((C_out_pad, N * L_pad), jnp.float32),     # resident raw conv output
                pltpu.VMEM((C_out_pad, 2), jnp.float32),             # sum / sum-of-squares
                pltpu.VMEM((C_out_pad, 2), jnp.float32),             # folded scale / shift
            ]),
        compiler_params=pltpu.CompilerParams(
            # Phase order and the resident stats/y scratches require sequential execution.
            # TODO(synk): a megacore-parallel (v7x) variant needs per-block partial stats
            # emitted as an output and summed in the wrapper instead of a shared scratch.
            dimension_semantics=("arbitrary", "arbitrary"),
            vmem_limit_bytes=32 << 20),
        cost_estimate=pl.CostEstimate(
            flops=flops, transcendentals=0, bytes_accessed=bytes_accessed),
    )(x_flat, wt, gb)

    # (N, C_out_pad, L_pad) -> drop channel/lane padding -> (N, C_out, OH, W) -> drop garbage
    # columns.  No NHWC<->NCHW transpose pass over HBM.
    return out_padded[:, :C_out, :L].reshape(N, C_out, OH, W)[:, :, :, :OW]


def _reference_forward(x, weight, bias, gamma, beta):
    """Pure-JAX f32 reference (lax conv + bias + training-mode BN + ReLU)."""
    y = lax.conv_general_dilated(
        x, weight, window_strides=(1, 1), padding="VALID",
        dimension_numbers=("NCHW", "OIHW", "NCHW"),
    ) + bias.reshape(1, -1, 1, 1)
    mean = jnp.mean(y, axis=(0, 2, 3), keepdims=True)
    var = jnp.mean((y - mean) ** 2, axis=(0, 2, 3), keepdims=True)
    y = (y - mean) * lax.rsqrt(var + BN_EPS)
    y = y * gamma.reshape(1, -1, 1, 1) + beta.reshape(1, -1, 1, 1)
    return jnp.maximum(y, 0.0)


if __name__ == "__main__":
    # Small deterministic setup: batch=2, in_ch=4, out_ch=8, spatial=16.
    N, C_in, C_out, H, W = 2, 4, 8, 16, 16
    key = jax.random.PRNGKey(0)
    kx, kw_, kb, kg, kbe = jax.random.split(key, 5)

    x = jax.random.normal(kx, (N, C_in, H, W), dtype=jnp.float32)
    fan_in = C_in * KH * KW
    weight = jax.random.normal(kw_, (C_out, C_in, KH, KW), dtype=jnp.float32) / np.sqrt(fan_in)
    bias = jax.random.normal(kb, (C_out,), dtype=jnp.float32) * 0.1
    gamma = 1.0 + 0.1 * jax.random.normal(kg, (C_out,), dtype=jnp.float32)
    beta = 0.1 * jax.random.normal(kbe, (C_out,), dtype=jnp.float32)

    ref = jax.block_until_ready(_reference_forward(x, weight, bias, gamma, beta))

    # Default path: bf16 matmul operands, f32 accumulation + f32 BN/ReLU epilogue.
    out_bf16 = jax.block_until_ready(conv3x3_forward(x, weight, bias, gamma, beta))
    assert out_bf16.shape == (N, C_out, H - 1, W - 1), out_bf16.shape
    np.testing.assert_allclose(np.asarray(out_bf16), np.asarray(ref), rtol=5e-2, atol=5e-2)

    # Full-precision path: identical structure, f32 operands, tight match to the reference.
    out_f32 = jax.block_until_ready(
        conv3x3_forward(x, weight, bias, gamma, beta, op_dtype=jnp.float32))
    np.testing.assert_allclose(np.asarray(out_f32), np.asarray(ref), rtol=1e-4, atol=1e-4)

    print("KERNEL_OK")
</pallas_src>

<mosaic_0001>
module attributes {stable_mosaic.version = 11 : i64} {
  func.func @_fused_conv_bn_relu_kernel(%arg0: i32, %arg1: i32, %arg2: memref<2x8x384xbf16, #tpu.memory_space<vmem>>, %arg3: memref<8x32xbf16, #tpu.memory_space<vmem>>, %arg4: memref<8x2xf32, #tpu.memory_space<vmem>>, %arg5: memref<2x8x256xf32, #tpu.memory_space<vmem>>, %arg6: memref<32x512xbf16, #tpu.memory_space<vmem>>, %arg7: memref<8x512xf32, #tpu.memory_space<vmem>>, %arg8: memref<8x2xf32, #tpu.memory_space<vmem>>, %arg9: memref<8x2xf32, #tpu.memory_space<vmem>>) attributes {dimension_semantics = [#tpu.dimension_semantics<arbitrary>, #tpu.dimension_semantics<arbitrary>], iteration_bounds = array<i64: 2, 1>, scalar_prefetch = 0 : i64, scratch_operands = 4 : i64, tpu.core_type = #tpu.core_type<tc>, window_params = [{transform_indices = @transform_0, window_bounds = array<i64: 2, 8, 384>}, {pipeline_mode = #tpu.pipeline_mode<synchronous>, transform_indices = @transform_1, window_bounds = array<i64: 8, 32>}, {pipeline_mode = #tpu.pipeline_mode<synchronous>, transform_indices = @transform_2, window_bounds = array<i64: 8, 2>}, {transform_indices = @transform_3, window_bounds = array<i64: 2, 8, 256>}]} {
    %c0_i32 = arith.constant 0 : i32
    %0 = arith.cmpi eq, %arg0, %c0_i32 : i32
    %c0_i32_0 = arith.constant 0 : i32
    %1 = arith.cmpi eq, %arg1, %c0_i32_0 : i32
    %2 = arith.andi %0, %1 : i1
    %3 = arith.extui %2 : i1 to i32
    %c0_i32_1 = arith.constant 0 : i32
    %4 = arith.cmpi ne, %3, %c0_i32_1 : i32
    scf.if %4 {
      %cst = arith.constant 0.000000e+00 : f32
      %16 = vector.broadcast %cst : f32 to vector<8x2xf32>
      %c0 = arith.constant 0 : index
      %c0_8 = arith.constant 0 : index
      %17 = vector.load %arg8[%c0, %c0_8] : memref<8x2xf32, #tpu.memory_space<vmem>>, vector<8x2xf32>
      tpu.vector_store %arg8[%c0, %c0_8], %16 {strides = array<i32>} : memref<8x2xf32, #tpu.memory_space<vmem>>, vector<8x2xf32>,
    } else {
    }
    %c0_i32_2 = arith.constant 0 : i32
    %5 = arith.cmpi eq, %arg0, %c0_i32_2 : i32
    %6 = arith.extui %5 : i1 to i32
    %c0_i32_3 = arith.constant 0 : i32
    %7 = arith.cmpi ne, %6, %c0_i32_3 : i32
    scf.if %7 {
      %c0 = arith.constant 0 : index
      %c0_8 = arith.constant 0 : index
      %c0_9 = arith.constant 0 : index
      %16 = vector.load %arg2[%c0, %c0_8, %c0_9] : memref<2x8x384xbf16, #tpu.memory_space<vmem>>, vector<1x8x256xbf16>
      %17 = vector.shape_cast %16 : vector<1x8x256xbf16> to vector<8x256xbf16>
      %c0_10 = arith.constant 0 : index
      %c0_11 = arith.constant 0 : index
      %18 = vector.load %arg6[%c0_10, %c0_11] : memref<32x512xbf16, #tpu.memory_space<vmem>>, vector<8x256xbf16>
      tpu.vector_store %arg6[%c0_10, %c0_11], %17 {strides = array<i32>} : memref<32x512xbf16, #tpu.memory_space<vmem>>, vector<8x256xbf16>,
      %c0_12 = arith.constant 0 : index
      %c0_13 = arith.constant 0 : index
      %c1 = arith.constant 1 : index
      %19 = vector.load %arg2[%c0_12, %c0_13, %c1] : memref<2x8x384xbf16, #tpu.memory_space<vmem>>, vector<1x8x256xbf16>
      %20 = vector.shape_cast %19 : vector<1x8x256xbf16> to vector<8x256xbf16>
      %c8 = arith.constant 8 : index
      %c0_14 = arith.constant 0 : index
      %21 = vector.load %arg6[%c8, %c0_14] : memref<32x512xbf16, #tpu.memory_space<vmem>>, vector<8x256xbf16>
      tpu.vector_store %arg6[%c8, %c0_14], %20 {strides = array<i32>} : memref<32x512xbf16, #tpu.memory_space<vmem>>, vector<8x256xbf16>,
      %c0_15 = arith.constant 0 : index
      %c0_16 = arith.constant 0 : index
      %c16 = arith.constant 16 : index
      %22 = vector.load %arg2[%c0_15, %c0_16, %c16] : memref<2x8x384xbf16, #tpu.memory_space<vmem>>, vector<1x8x256xbf16>
      %23 = vector.shape_cast %22 : vector<1x8x256xbf16> to vector<8x256xbf16>
      %c16_17 = arith.constant 16 : index
      %c0_18 = arith.constant 0 : index
      %24 = vector.load %arg6[%c16_17, %c0_18] : memref<32x512xbf16, #tpu.memory_space<vmem>>, vector<8x256xbf16>
      tpu.vector_store %arg6[%c16_17, %c0_18], %23 {strides = array<i32>} : memref<32x512xbf16, #tpu.memory_space<vmem>>, vector<8x256xbf16>,
      %c0_19 = arith.constant 0 : index
      %c0_20 = arith.constant 0 : index
      %c17 = arith.constant 17 : index
      %25 = vector.load %arg2[%c0_19, %c0_20, %c17] : memref<2x8x384xbf16, #tpu.memory_space<vmem>>, vector<1x8x256xbf16>
      %26 = vector.shape_cast %25 : vector<1x8x256xbf16> to vector<8x256xbf16>
      %c24 = arith.constant 24 : index
      %c0_21 = arith.constant 0 : index
      %27 = vector.load %arg6[%c24, %c0_21] : memref<32x512xbf16, #tpu.memory_space<vmem>>, vector<8x256xbf16>
      tpu.vector_store %arg6[%c24, %c0_21], %26 {strides = array<i32>} : memref<32x512xbf16, #tpu.memory_space<vmem>>, vector<8x256xbf16>,
      %c1_22 = arith.constant 1 : index
      %c0_23 = arith.constant 0 : index
      %c0_24 = arith.constant 0 : index
      %28 = vector.load %arg2[%c1_22, %c0_23, %c0_24] : memref<2x8x384xbf16, #tpu.memory_space<vmem>>, vector<1x8x256xbf16>
      %29 = vector.shape_cast %28 : vector<1x8x256xbf16> to vector<8x256xbf16>
      %c0_25 = arith.constant 0 : index
      %c256 = arith.constant 256 : index
      %30 = vector.load %arg6[%c0_25, %c256] : memref<32x512xbf16, #tpu.memory_space<vmem>>, vector<8x256xbf16>
      tpu.vector_store %arg6[%c0_25, %c256], %29 {strides = array<i32>} : memref<32x512xbf16, #tpu.memory_space<vmem>>, vector<8x256xbf16>,
      %c1_26 = arith.constant 1 : index
      %c0_27 = arith.constant 0 : index
      %c1_28 = arith.constant 1 : index
      %31 = vector.load %arg2[%c1_26, %c0_27, %c1_28] : memref<2x8x384xbf16, #tpu.memory_space<vmem>>, vector<1x8x256xbf16>
      %32 = vector.shape_cast %31 : vector<1x8x256xbf16> to vector<8x256xbf16>
      %c8_29 = arith.constant 8 : index
      %c256_30 = arith.constant 256 : index
      %33 = vector.load %arg6[%c8_29, %c256_30] : memref<32x512xbf16, #tpu.memory_space<vmem>>, vector<8x256xbf16>
      tpu.vector_store %arg6[%c8_29, %c256_30], %32 {strides = array<i32>} : memref<32x512xbf16, #tpu.memory_space<vmem>>, vector<8x256xbf16>,
      %c1_31 = arith.constant 1 : index
      %c0_32 = arith.constant 0 : index
      %c16_33 = arith.constant 16 : index
      %34 = vector.load %arg2[%c1_31, %c0_32, %c16_33] : memref<2x8x384xbf16, #tpu.memory_space<vmem>>, vector<1x8x256xbf16>
      %35 = vector.shape_cast %34 : vector<1x8x256xbf16> to vector<8x256xbf16>
      %c16_34 = arith.constant 16 : index
      %c256_35 = arith.constant 256 : index
      %36 = vector.load %arg6[%c16_34, %c256_35] : memref<32x512xbf16, #tpu.memory_space<vmem>>, vector<8x256xbf16>
      tpu.vector_store %arg6[%c16_34, %c256_35], %35 {strides = array<i32>} : memref<32x512xbf16, #tpu.memory_space<vmem>>, vector<8x256xbf16>,
      %c1_36 = arith.constant 1 : index
      %c0_37 = arith.constant 0 : index
      %c17_38 = arith.constant 17 : index
      %37 = vector.load %arg2[%c1_36, %c0_37, %c17_38] : memref<2x8x384xbf16, #tpu.memory_space<vmem>>, vector<1x8x256xbf16>
      %38 = vector.shape_cast %37 : vector<1x8x256xbf16> to vector<8x256xbf16>
      %c24_39 = arith.constant 24 : index
      %c256_40 = arith.constant 256 : index
      %39 = vector.load %arg6[%c24_39, %c256_40] : memref<32x512xbf16, #tpu.memory_space<vmem>>, vector<8x256xbf16>
      tpu.vector_store %arg6[%c24_39, %c256_40], %38 {strides = array<i32>} : memref<32x512xbf16, #tpu.memory_space<vmem>>, vector<8x256xbf16>,
      %c0_41 = arith.constant 0 : index
      %c0_42 = arith.constant 0 : index
      %40 = vector.load %arg3[%c0_41, %c0_42] : memref<8x32xbf16, #tpu.memory_space<vmem>>, vector<8x32xbf16>
      %c0_43 = arith.constant 0 : index
      %c0_44 = arith.constant 0 : index
      %41 = vector.load %arg6[%c0_43, %c0_44] : memref<32x512xbf16, #tpu.memory_space<vmem>>, vector<32x512xbf16>
      %cst = arith.constant dense<0.000000e+00> : vector<8x512xf32>
      %42 = tpu.matmul %40, %41, %cst {dimension_numbers = #tpu.dot_dimension_numbers<[1], [0], [0], [1], [0, 0, 1, 1], [], []>} : vector<8x32xbf16>, vector<32x512xbf16>, vector<8x512xf32> -> vector<8x512xf32>
      %43 = tpu.iota {dimensions = array<i32: 1>} : vector<1x512xi32>
      %c256_i32 = arith.constant 256 : i32
      %c0_i32_45 = arith.constant 0 : i32
      %44 = arith.cmpi eq, %c256_i32, %c0_i32_45 : i32
      %c1_i32_46 = arith.constant 1 : i32
      %45 = arith.select %44, %c1_i32_46, %c256_i32 : i32
      %46 = vector.broadcast %45 : i32 to vector<1x512xi32>
      %47 = arith.remsi %43, %46 : vector<1x512xi32>
      %c0_i32_47 = arith.constant 0 : i32
      %48 = vector.broadcast %c0_i32_47 : i32 to vector<1x512xi32>
      %49 = arith.cmpi ne, %47, %48 : vector<1x512xi32>
      %c0_i32_48 = arith.constant 0 : i32
      %50 = vector.broadcast %c0_i32_48 : i32 to vector<1x512xi32>
      %51 = arith.cmpi slt, %47, %50 : vector<1x512xi32>
      %c0_i32_49 = arith.constant 0 : i32
      %52 = arith.cmpi slt, %45, %c0_i32_49 : i32
      %53 = vector.broadcast %52 : i1 to vector<1x512xi1>
      %54 = vector.broadcast %53 : vector<1x512xi1> to vector<1x512xi1>
      %55 = arith.xori %51, %54 : vector<1x512xi1>
      %56 = arith.andi %55, %49 : vector<1x512xi1>
      %57 = vector.broadcast %45 : i32 to vector<1x512xi32>
      %58 = arith.addi %47, %57 : vector<1x512xi32>
      %59 = arith.select %56, %58, %47 : vector<1x512xi1>, vector<1x512xi32>
      %c240_i32 = arith.constant 240 : i32
      %60 = vector.broadcast %c240_i32 : i32 to vector<1x512xi32>
      %61 = arith.cmpi slt, %59, %60 : vector<1x512xi32>
      %c16_i32 = arith.constant 16 : i32
      %c0_i32_50 = arith.constant 0 : i32
      %62 = arith.cmpi eq, %c16_i32, %c0_i32_50 : i32
      %c1_i32_51 = arith.constant 1 : i32
      %63 = arith.select %62, %c1_i32_51, %c16_i32 : i32
      %64 = vector.broadcast %63 : i32 to vector<1x512xi32>
      %65 = arith.remsi %59, %64 : vector<1x512xi32>
      %c0_i32_52 = arith.constant 0 : i32
      %66 = vector.broadcast %c0_i32_52 : i32 to vector<1x512xi32>
      %67 = arith.cmpi ne, %65, %66 : vector<1x512xi32>
      %c0_i32_53 = arith.constant 0 : i32
      %68 = vector.broadcast %c0_i32_53 : i32 to vector<1x512xi32>
      %69 = arith.cmpi slt, %65, %68 : vector<1x512xi32>
      %c0_i32_54 = arith.constant 0 : i32
      %70 = arith.cmpi slt, %63, %c0_i32_54 : i32
      %71 = vector.broadcast %70 : i1 to vector<1x512xi1>
      %72 = vector.broadcast %71 : vector<1x512xi1> to vector<1x512xi1>
      %73 = arith.xori %69, %72 : vector<1x512xi1>
      %74 = arith.andi %73, %67 : vector<1x512xi1>
      %75 = vector.broadcast %63 : i32 to vector<1x512xi32>
      %76 = arith.addi %65, %75 : vector<1x512xi32>
      %77 = arith.select %74, %76, %65 : vector<1x512xi1>, vector<1x512xi32>
      %c15_i32 = arith.constant 15 : i32
      %78 = vector.broadcast %c15_i32 : i32 to vector<1x512xi32>
      %79 = arith.cmpi slt, %77, %78 : vector<1x512xi32>
      %80 = arith.andi %61, %79 : vector<1x512xi1>
      %cst_55 = arith.constant 0.000000e+00 : f32
      %81 = vector.shape_cast %80 : vector<1x512xi1> to vector<1x512xi1>
      %82 = vector.broadcast %81 : vector<1x512xi1> to vector<8x512xi1>
      %83 = vector.broadcast %cst_55 : f32 to vector<8x512xf32>
      %84 = arith.select %82, %42, %83 : vector<8x512xi1>, vector<8x512xf32>
      %cst_56 = arith.constant dense<0.000000e+00> : vector<8xf32>
      %85 = vector.multi_reduction <add>, %84, %cst_56 [1] : vector<8x512xf32> to vector<8xf32>
      %86 = vector.shape_cast %85 : vector<8xf32> to vector<8x1xf32>
      %87 = arith.mulf %84, %84 : vector<8x512xf32>
      %cst_57 = arith.constant dense<0.000000e+00> : vector<8xf32>
      %88 = vector.multi_reduction <add>, %87, %cst_57 [1] : vector<8x512xf32> to vector<8xf32>
      %89 = vector.shape_cast %88 : vector<8xf32> to vector<8x1xf32>
      %c0_58 = arith.constant 0 : index
      %c0_59 = arith.constant 0 : index
      %90 = vector.load %arg8[%c0_58, %c0_59] : memref<8x2xf32, #tpu.memory_space<vmem>>, vector<8x2xf32>
      %91 = tpu.concatenate %86, %89 in 1 : vector<8x1xf32>, vector<8x1xf32> -> vector<8x2xf32>
      %92 = arith.addf %90, %91 : vector<8x2xf32>
      %c0_60 = arith.constant 0 : index
      %c0_61 = arith.constant 0 : index
      %93 = vector.load %arg8[%c0_60, %c0_61] : memref<8x2xf32, #tpu.memory_space<vmem>>, vector<8x2xf32>
      tpu.vector_store %arg8[%c0_60, %c0_61], %92 {strides = array<i32>} : memref<8x2xf32, #tpu.memory_space<vmem>>, vector<8x2xf32>,
      %c512_i32 = arith.constant 512 : i32
      %94 = arith.muli %arg1, %c512_i32 : i32
      %95 = tpu.assume_multiple %94, 128 : i32
      %c0_62 = arith.constant 0 : index
      %96 = arith.index_cast %95 : i32 to index
      %97 = vector.load %arg7[%c0_62, %96] : memref<8x512xf32, #tpu.memory_space<vmem>>, vector<8x512xf32>
      tpu.vector_store %arg7[%c0_62, %96], %42 {strides = array<i32>} : memref<8x512xf32, #tpu.memory_space<vmem>>, vector<8x512xf32>,
    } else {
    }
    %c1_i32 = arith.constant 1 : i32
    %8 = arith.cmpi eq, %arg0, %c1_i32 : i32
    %c0_i32_4 = arith.constant 0 : i32
    %9 = arith.cmpi eq, %arg1, %c0_i32_4 : i32
    %10 = arith.andi %8, %9 : i1
    %11 = arith.extui %10 : i1 to i32
    %c0_i32_5 = arith.constant 0 : i32
    %12 = arith.cmpi ne, %11, %c0_i32_5 : i32
    scf.if %12 {
      %c0 = arith.constant 0 : index
      %c0_8 = arith.constant 0 : index
      %16 = vector.load %arg8[%c0, %c0_8] : memref<8x2xf32, #tpu.memory_space<vmem>>, vector<8x2xf32>
      %17 = vector.extract_strided_slice %16 {offsets = [0, 0], sizes = [8, 1], strides = [1, 1]} : vector<8x2xf32> to vector<8x1xf32>
      %cst = arith.constant 0.00222222228 : f32
      %18 = vector.broadcast %cst : f32 to vector<8x1xf32>
      %19 = arith.mulf %17, %18 : vector<8x1xf32>
      %20 = vector.extract_strided_slice %16 {offsets = [0, 1], sizes = [8, 1], strides = [1, 1]} : vector<8x2xf32> to vector<8x1xf32>
      %cst_9 = arith.constant 0.00222222228 : f32
      %21 = vector.broadcast %cst_9 : f32 to vector<8x1xf32>
      %22 = arith.mulf %20, %21 : vector<8x1xf32>
      %23 = arith.mulf %19, %19 : vector<8x1xf32>
      %24 = arith.subf %22, %23 : vector<8x1xf32>
      %cst_10 = arith.constant 9.99999974E-6 : f32
      %25 = vector.broadcast %cst_10 : f32 to vector<8x1xf32>
      %26 = arith.addf %24, %25 : vector<8x1xf32>
      %27 = math.rsqrt %26 : vector<8x1xf32>
      %c0_11 = arith.constant 0 : index
      %c0_12 = arith.constant 0 : index
      %28 = vector.load %arg4[%c0_11, %c0_12] : memref<8x2xf32, #tpu.memory_space<vmem>>, vector<8x1xf32>
      %29 = arith.mulf %28, %27 : vector<8x1xf32>
      %c0_13 = arith.constant 0 : index
      %c1 = arith.constant 1 : index
      %30 = vector.load %arg4[%c0_13, %c1] : memref<8x2xf32, #tpu.memory_space<vmem>>, vector<8x1xf32>
      %31 = arith.mulf %19, %29 : vector<8x1xf32>
      %32 = arith.subf %30, %31 : vector<8x1xf32>
      %33 = tpu.concatenate %29, %32 in 1 : vector<8x1xf32>, vector<8x1xf32> -> vector<8x2xf32>
      %c0_14 = arith.constant 0 : index
      %c0_15 = arith.constant 0 : index
      %34 = vector.load %arg9[%c0_14, %c0_15] : memref<8x2xf32, #tpu.memory_space<vmem>>, vector<8x2xf32>
      tpu.vector_store %arg9[%c0_14, %c0_15], %33 {strides = array<i32>} : memref<8x2xf32, #tpu.memory_space<vmem>>, vector<8x2xf32>,
    } else {
    }
    %c1_i32_6 = arith.constant 1 : i32
    %13 = arith.cmpi eq, %arg0, %c1_i32_6 : i32
    %14 = arith.extui %13 : i1 to i32
    %c0_i32_7 = arith.constant 0 : i32
    %15 = arith.cmpi ne, %14, %c0_i32_7 : i32
    scf.if %15 {
      %c512_i32 = arith.constant 512 : i32
      %16 = arith.muli %arg1, %c512_i32 : i32
      %17 = tpu.assume_multiple %16, 128 : i32
      %c0 = arith.constant 0 : index
      %18 = arith.index_cast %17 : i32 to index
      %19 = vector.load %arg7[%c0, %18] : memref<8x512xf32, #tpu.memory_space<vmem>>, vector<8x512xf32>
      %c0_8 = arith.constant 0 : index
      %c0_9 = arith.constant 0 : index
      %20 = vector.load %arg9[%c0_8, %c0_9] : memref<8x2xf32, #tpu.memory_space<vmem>>, vector<8x1xf32>
      %21 = vector.broadcast %20 : vector<8x1xf32> to vector<8x512xf32>
      %22 = arith.mulf %19, %21 : vector<8x512xf32>
      %c0_10 = arith.constant 0 : index
      %c1 = arith.constant 1 : index
      %23 = vector.load %arg9[%c0_10, %c1] : memref<8x2xf32, #tpu.memory_space<vmem>>, vector<8x1xf32>
      %24 = vector.broadcast %23 : vector<8x1xf32> to vector<8x512xf32>
      %25 = arith.addf %22, %24 : vector<8x512xf32>
      %cst = arith.constant 0.000000e+00 : f32
      %26 = vector.broadcast %cst : f32 to vector<8x512xf32>
      %27 = arith.maximumf %25, %26 : vector<8x512xf32>
      %28 = vector.extract_strided_slice %27 {offsets = [0, 0], sizes = [8, 256], strides = [1, 1]} : vector<8x512xf32> to vector<8x256xf32>
      %c0_11 = arith.constant 0 : index
      %c0_12 = arith.constant 0 : index
      %c0_13 = arith.constant 0 : index
      %29 = vector.load %arg5[%c0_11, %c0_12, %c0_13] : memref<2x8x256xf32, #tpu.memory_space<vmem>>, vector<1x8x256xf32>
      %30 = vector.shape_cast %29 : vector<1x8x256xf32> to vector<8x256xf32>
      %31 = vector.shape_cast %28 : vector<8x256xf32> to vector<1x8x256xf32>
      tpu.vector_store %arg5[%c0_11, %c0_12, %c0_13], %31 {strides = array<i32>} : memref<2x8x256xf32, #tpu.memory_space<vmem>>, vector<1x8x256xf32>,
      %32 = vector.extract_strided_slice %27 {offsets = [0, 256], sizes = [8, 256], strides = [1, 1]} : vector<8x512xf32> to vector<8x256xf32>
      %c1_14 = arith.constant 1 : index
      %c0_15 = arith.constant 0 : index
      %c0_16 = arith.constant 0 : index
      %33 = vector.load %arg5[%c1_14, %c0_15, %c0_16] : memref<2x8x256xf32, #tpu.memory_space<vmem>>, vector<1x8x256xf32>
      %34 = vector.shape_cast %33 : vector<1x8x256xf32> to vector<8x256xf32>
      %35 = vector.shape_cast %32 : vector<8x256xf32> to vector<1x8x256xf32>
      tpu.vector_store %arg5[%c1_14, %c0_15, %c0_16], %35 {strides = array<i32>} : memref<2x8x256xf32, #tpu.memory_space<vmem>>, vector<1x8x256xf32>,
    } else {
    }
    return
  }
  func.func @transform_0(%arg0: i32, %arg1: i32) -> (i32, i32, i32) {
    %c1_i32 = arith.constant 1 : i32
    %0 = arith.subi %c1_i32, %arg0 : i32
    %1 = arith.muli %arg1, %0 : i32
    %c0_i32 = arith.constant 0 : i32
    %c0_i32_0 = arith.constant 0 : i32
    %c0_i32_1 = arith.constant 0 : i32
    return %1, %c0_i32, %c0_i32_0 : i32, i32, i32
  }
  func.func @transform_1(%arg0: i32, %arg1: i32) -> (i32, i32) {
    %c0_i32 = arith.constant 0 : i32
    %c0_i32_0 = arith.constant 0 : i32
    %c0_i32_1 = arith.constant 0 : i32
    return %c0_i32, %c0_i32_0 : i32, i32
  }
  func.func @transform_2(%arg0: i32, %arg1: i32) -> (i32, i32) {
    %c0_i32 = arith.constant 0 : i32
    %c0_i32_0 = arith.constant 0 : i32
    %c0_i32_1 = arith.constant 0 : i32
    return %c0_i32, %c0_i32_0 : i32, i32
  }
  func.func @transform_3(%arg0: i32, %arg1: i32) -> (i32, i32, i32) {
    %0 = arith.muli %arg1, %arg0 : i32
    %c0_i32 = arith.constant 0 : i32
    %c0_i32_0 = arith.constant 0 : i32
    %c0_i32_1 = arith.constant 0 : i32
    return %0, %c0_i32, %c0_i32_0 : i32, i32, i32
  }
}

</mosaic_0001>

<bundles_post_ra>
// kernel: conv3x3_forward.1
= control target key start
LH: loop header
LB: loop body
LE: loop exit
PB: predicated region body
PF: predicated region fallthrough
CT: control target
= control target key end

     0   :  { %s873_s12 = smov 0   ;;  %s875_s13 = smov 0   ;;  %s969_s0 = inlined_call_operand.vmem [shape: bf16[2,8,384], index: 0, kind: input, shape index: {}]   ;;  %s970_s1 = inlined_call_operand.vmem [shape: bf16[8,32], index: 1, kind: input, shape index: {}]   ;;  %s971_s2 = inlined_call_operand.vmem [shape: f32[8,2], index: 2, kind: input, shape index: {}]   ;;  %s972_s3 = inlined_call_operand.vmem [shape: f32[2,8,256], index: 3, kind: output, shape index: {}]  }
   0x1   :  { %s877_s14 = smov 0  }
   0x2 LB: > { %s25_s15 = sadd.s32 1, %s838_s13  ;;  %p753_p0 = scmp.ge.s32.totalorder %s842_s14, 1  ;;  %s842_s14 = sphi %s877_s14, %s13_s14   ;;  %s838_s13 = sphi %s875_s13, %s974_s13   ;;  %s834_s12 = sphi %s873_s12, %s973_s12  }
   0x3   : > { %p27_p1 = scmp.ge.s32.totalorder %s25_s15, 2  ;;  %p161_p2 = scmp.lt.s32.totalorder %s842_s14, 3 }
   0x5   : > { %s976_s15 = smov (%p27_p1, %s25_s15), 0  ;;  %p162_p3 = pnand %p753_p0, %p161_p2 }
   0x6   : > { %p211_p4 = scmp.eq.s32.totalorder (!%p162_p3), %s834_s12, 0 }
   0x7   : > { %165 = sbr.rel (%p162_p3) target bundleno = 1038 (0x40e), region = 32 }
   0xc   : > { %216 = sbr.rel (!%p211_p4) target bundleno = 17 (0x11), region = 36  ;;  %vm217_vm0 = vcmask (%p211_p4), 15360   ;;  %v844_v0 = vmov (%p211_p4), 0.0  }
   0xd   : > { %218 = vst.msk [vmem:[#allocation4] sm:$0xff] (%p211_p4), %vm217_vm0, %v844_v0 }
  0x11 PF: > { %p755_p5 = scmp.ne.s32.totalorder %s834_s12, 0 }
  0x12   : > { %s845_s18 = smov (!%p755_p5), 111   ;;  %s846_s19 = smov (!%p755_p5), 112  }
  0x13   : > { %221 = sbr.rel (%p755_p5) target bundleno = 512 (0x200), region = 40  ;;  %s848_s26 = smov (!%p755_p5), 127  }
  0x18   : > { %v255_v1 = vld [vmem:[%s969_s0] sm:$0xff]  ;;  %v256_v2 = vld [vmem:[%s969_s0 + $0x8] sm:$0xf]  ;;  %v847_v5 = vmov 0   ;;  %v760_v6 = vld [vmem:[%s969_s0 + $0x14] sm:$0xf]  ;;  %v450_v55 = vlaneseq }
  0x19   : > { %259 = vrot.lane.b32.xlu1 %v255_v1, %s845_s18  ;;  %244 = vrot.lane.b32.xlu0 %v255_v1, %s846_s19  ;;  %v241_v3 = vld [vmem:[%s969_s0 + $0x8] sm:$0xf]  ;;  %v913_v7 = vld [vmem:[%s969_s0 + $0xc] sm:$0xff]  ;;  %vm234_vm1 = vcmask 1043456   ;;  %vm251_vm2 = vcmask 916480   ;;  %vm266_vm3 = vcmask 908288  }
  0x1a   : > { %v225_v4 = vld [vmem:[%s969_s0 + $0x8] sm:$0xf]  ;;  %400 = vmatprep.mubr.bf16.mxu0 %v847_v5  ;;  %441 = vmatprep.mubr.bf16.mxu1 %v847_v5  ;;  %v762_v8 = vld [vmem:[%s969_s0 + $0x14] sm:$0xf]  ;;  %vm236_vm4 = vcmask 1039360   ;;  %vm364_vm5 = vcmask 261120  }
  0x1b   : > { %v758_v9 = vld [vmem:[%s969_s0 + $0x14] sm:$0xf]  ;;  %v315_v38 = vld [vmem:[%s970_s1] sm:$0xf]  ;;  %v451_v56 = vand.u32 127, %v450_v55  ;;  %vm590_vm14 = vcmask 7168  }
  0x1c   : > { %vm593_vm15 = vcmask 15360  }
  0x1d   : > { %261 = vrot.lane.b32.xlu1 %v256_v2, %s845_s18  ;;  %246 = vrot.lane.b32.xlu0 %v241_v3, %s846_s19  ;;  %v452_v57 = vadd.s32 128, %v451_v56  ;;  %v459_v59 = vand.u32 255, %v451_v56  ;;  %v454_v61 = vadd.s32 384, %v451_v56  ;;  %v453_v62 = vadd.s32 256, %v451_v56 }
  0x1f   : > { %v466_v58 = vand.u32 255, %v452_v57  ;;  %v511_v0 = vand.u32 15, %v459_v59  ;;  %v473_v3 = vand.u32 255, %v453_v62 }
  0x21   : > { %230 = vrot.lane.b32.xlu1 %v225_v4, %s848_s26  ;;  %228 = vrot.lane.b32.xlu0 %v255_v1, %s848_s26  ;;  %v518_v60 = vand.u32 15, %v466_v58  ;;  %vm504_vm6 = vcmp.lt.s32.totalorder %v466_v58, 240  ;;  %vm555_vm8 = vcmp.lt.s32.totalorder %v511_v0, 15 }
  0x23   : > { %vm556_vm7 = vcmp.lt.s32.totalorder %v518_v60, 15 }
  0x24   : > { %vm560_vm9 = vmand %vm504_vm6, %vm556_vm7 }
  0x25   : > { %293 = vrot.lane.b32.xlu1 %v760_v6, %s846_s19  ;;  %291 = vrot.lane.b32.xlu0 %v913_v7, %s846_s19 }
  0x29   : > { %307 = vrot.lane.b32.xlu1 %v762_v8, %s845_s18  ;;  %305 = vrot.lane.b32.xlu0 %v913_v7, %s845_s18 }
  0x2d   : > { %279 = vrot.lane.b32.xlu1 %v758_v9, %s848_s26  ;;  %277 = vrot.lane.b32.xlu0 %v913_v7, %s848_s26 }
  0x8b   : > { %v260_v10 = vpop.permute.xlu1 %259  ;;  %v245_v11 = vpop.permute.xlu0 %244 }
  0x8c   : > { %v263_v14 = vrot.slane %v260_v10, 4  ;;  %v248_v15 = vrot.slane %v245_v11, 4 }
  0x8f   : > { %v262_v12 = vpop.permute.xlu1 %261  ;;  %v247_v13 = vpop.permute.xlu0 %246 }
  0x90   : > { %v264_v16 = vrot.slane %v262_v12, 4  ;;  %v249_v17 = vrot.slane %v247_v13, 4 }
  0x92   : > { %v250_v18 = vsel %vm234_vm1, %v248_v15, %v249_v17  ;;  %v265_v19 = vsel %vm234_vm1, %v263_v14, %v264_v16 }
  0x93   : > { %v231_v20 = vpop.permute.xlu1 %230  ;;  %v229_v21 = vpop.permute.xlu0 %228  ;;  %v252_v22 = vsel %vm251_vm2, %v245_v11, %v250_v18  ;;  %v267_v23 = vsel %vm266_vm3, %v260_v10, %v265_v19 }
  0x94   : > { %v233_v24 = vrot.slane %v231_v20, 4  ;;  %v232_v25 = vrot.slane %v229_v21, 4  ;;  %v768_v26 = vcombine.high %v252_v22, %v267_v23  ;;  %v767_v27 = vcombine.low %v252_v22, %v267_v23 }
  0x96   : > { %v235_v28 = vsel %vm234_vm1, %v232_v25, %v233_v24  ;;  %380 = vmatprep.subr.bf16.mxu0 %v768_v26  ;;  %v589_v26 = vld [vmem:[#allocation4] sm:$0xff] }
  0x97   : > { %v237_v29 = vsel %vm236_vm4, %v229_v21, %v235_v28  ;;  %381 = vmatpush1.bf16.msra.mxu0 %v767_v27  ;;  %v294_v30 = vpop.permute.xlu1 %293  ;;  %v292_v31 = vpop.permute.xlu0 %291 }
  0x98   : > { %v763_v32 = vcombine.low %v255_v1, %v237_v29  ;;  %v764_v33 = vcombine.high %v255_v1, %v237_v29  ;;  %v296_v34 = vrot.slane %v294_v30, 4  ;;  %v295_v35 = vrot.slane %v292_v31, 4 }
  0x99   : > { %v480_v1 = vand.u32 255, %v454_v61 }
  0x9a   : > { %382 = vmatprep.subr.bf16.mxu0 %v764_v33  ;;  %v297_v41 = vsel %vm234_vm1, %v295_v35, %v296_v34 }
  0x9b   : > { %v308_v36 = vpop.permute.xlu1 %307  ;;  %v306_v37 = vpop.permute.xlu0 %305  ;;  %383 = vmatpush1.bf16.msra.mxu0 %v763_v32  ;;  %v298_v45 = vsel %vm251_vm2, %v292_v31, %v297_v41  ;;  %v532_v5 = vand.u32 15, %v480_v1  ;;  %vm506_vm10 = vcmp.lt.s32.totalorder %v480_v1, 240 }
  0x9c   : > { %v310_v39 = vrot.slane %v308_v36, 4  ;;  %v309_v40 = vrot.slane %v306_v37, 4 }
  0x9d   : > { %vm558_vm11 = vcmp.lt.s32.totalorder %v532_v5, 15 }
  0x9e   : > { %771 = vmatmul.mubr.msk.bf16.vlgmr.msra.gmra.mxu0 %vm364_vm5, %v315_v38  ;;  %v311_v42 = vsel %vm234_vm1, %v309_v40, %v310_v39  ;;  %vm562_vm13 = vmand %vm506_vm10, %vm558_vm11 }
  0x9f   : > { %v280_v43 = vpop.permute.xlu1 %279  ;;  %v278_v44 = vpop.permute.xlu0 %277  ;;  %v312_v46 = vsel %vm266_vm3, %v306_v37, %v311_v42 }
  0xa0   : > { %v282_v47 = vrot.slane %v280_v43, 4  ;;  %v281_v48 = vrot.slane %v278_v44, 4  ;;  %v770_v49 = vcombine.high %v298_v45, %v312_v46  ;;  %v769_v50 = vcombine.low %v298_v45, %v312_v46 }
  0xa2   : > { %v283_v51 = vsel %vm234_vm1, %v281_v48, %v282_v47  ;;  %421 = vmatprep.subr.bf16.mxu1 %v770_v49 }
  0xa3   : > { %v284_v52 = vsel %vm236_vm4, %v278_v44, %v283_v51  ;;  %422 = vmatpush1.bf16.msra.mxu1 %v769_v50 }
  0xa4   : > { %v765_v53 = vcombine.low %v913_v7, %v284_v52  ;;  %v766_v54 = vcombine.high %v913_v7, %v284_v52  ;;  %v525_v7 = vand.u32 15, %v473_v3 }
  0xa6   : > { %423 = vmatprep.subr.bf16.mxu1 %v766_v54  ;;  %vm557_vm12 = vcmp.lt.s32.totalorder %v525_v7, 15 }
  0xa7   : > { %424 = vmatpush1.bf16.msra.mxu1 %v765_v53 }
  0xaa   : > { %772 = vmatmul.mubr.msk.bf16.vlgmr.msra.gmra.mxu1 %vm364_vm5, %v315_v38 }
 0x15e   : > { %v402_v63 = vpop.f32.mrf.mxu0 }
 0x15f   : > { %600 = vst [vmem:[#allocation3 + $0x10] sm:$0xff] %v402_v63  ;;  %v571_v8 = vsel %vm555_vm8, %v402_v63, 0.0 }
 0x160   : > { %v404_v2 = vpop.f32.mrf.mxu0  ;;  %v580_v10 = vmul.f32 %v571_v8, %v571_v8 }
 0x161   : > { %601 = vst [vmem:[#allocation3] sm:$0xff] %v404_v2  ;;  %v572_v9 = vsel %vm560_vm9, %v404_v2, 0.0 }
 0x162   : > { %v406_v4 = vpop.f32.mrf.mxu0  ;;  %v581_v11 = vmul.f32 %v572_v9, %v572_v9  ;;  %v575_v12 = vadd.f32 %v572_v9, %v571_v8 }
 0x164   : > { %v407_v6 = vpop.f32.mrf.mxu0  ;;  %v584_v15 = vadd.f32 %v581_v11, %v580_v10 }
 0x16a   : > { %v443_v13 = vpop.f32.mrf.mxu1 }
 0x16b   : > { %v573_v14 = vsel %vm557_vm12, %v443_v13, 0.0  ;;  %602 = vst [vmem:[#allocation3 + $0x18] sm:$0xff] %v443_v13 }
 0x16c   : > { %v576_v16 = vadd.f32 %v575_v12, %v573_v14  ;;  %v582_v17 = vmul.f32 %v573_v14, %v573_v14  ;;  %v445_v18 = vpop.f32.mrf.mxu1 }
 0x16d   : > { %v574_v19 = vsel %vm562_vm13, %v445_v18, 0.0  ;;  %603 = vst [vmem:[#allocation3 + $0x8] sm:$0xff] %v445_v18 }
 0x16e   : > { %v583_v20 = vmul.f32 %v574_v19, %v574_v19  ;;  %v447_v21 = vpop.f32.mrf.mxu1  ;;  %v577_v22 = vadd.f32 %v576_v16, %v574_v19  ;;  %v585_v23 = vadd.f32 %v584_v15, %v582_v17 }
 0x170   : > { %v448_v24 = vpop.f32.mrf.mxu1  ;;  %578 = vadd.xlane.f32.xlu0 %v577_v22  ;;  %v586_v25 = vadd.f32 %v585_v23, %v583_v20 }
 0x172   : > { %587 = vadd.xlane.f32.xlu1 %v586_v25 }
 0x1f9   : > { %v579_v27 = vpop.xlane.xlu0 %578 }
 0x1fb   : > { %v588_v28 = vpop.xlane.xlu1 %587 }
 0x1fc   : > { %v591_v29 = vsel %vm590_vm14, %v579_v27, %v588_v28 }
 0x1fd   : > { %v592_v30 = vadd.f32 %v591_v29, %v589_v26 }
 0x1ff   : > { %594 = vst.msk [vmem:[#allocation4] sm:$0xff] %vm593_vm15, %v592_v30 }
 0x200 PF: > { %p604_p6 = scmp.eq.s32.totalorder %s834_s12, 1 }
 0x201   : > { %s849_s10 = smov (%p604_p6), 1   ;;  %s850_s11 = smov (%p604_p6), 127   ;;  %v619_v38 = vld [vmem:[%s971_s2] sm:$0xff] (%p604_p6)  ;;  %vm631_vm0 = vcmask (%p604_p6), 7168   ;;  %vm633_vm1 = vcmask (%p604_p6), 15360  }
 0x202   : > { %608 = sbr.rel (!%p604_p6) target bundleno = 894 (0x37e), region = 44 }
 0x206   : > { %v609_v31 = vld [vmem:[#allocation4] sm:$0xff] (%p604_p6) }
 0x207   : > { %v610_v32 = vmul.f32 0.0022222223, %v609_v31 }
 0x209   : > { %v611_v33 = vmul.f32 %v610_v32, %v610_v32 }
 0x20b   : > { %613 = vrot.lane.b32.xlu0 %v611_v33, %s849_s10 }
 0x27d   : > { %v614_v34 = vpop.permute.xlu0 %613 }
 0x27e   : > { %v616_v35 = vsub.f32 %v610_v32, %v614_v34 }
 0x280   : > { %v617_v36 = vadd.f32 1e-05, %v616_v35 }
 0x282   : > { %816 = vrsqrt.f32 %v617_v36 }
 0x28f   : > { %v817_v37 = vpop.eup %816 }
 0x290   : > { %621 = vrot.lane.b32.xlu0 %v817_v37, %s850_s11 }
 0x302   : > { %v622_v39 = vpop.permute.xlu0 %621 }
 0x303   : > { %v624_v40 = vmul.f32 %v622_v39, %v619_v38 }
 0x305   : > { %v625_v41 = vmul.f32 %v624_v40, %v610_v32 }
 0x307   : > { %627 = vrot.lane.b32.xlu1 %v625_v41, %s849_s10 }
 0x379   : > { %v628_v42 = vpop.permute.xlu1 %627 }
 0x37a   : > { %v630_v43 = vsub.f32 %v619_v38, %v628_v42 }
 0x37c   : > { %v632_v44 = vsel %vm631_vm0, %v624_v40, %v630_v43 }
 0x37d   : > { %634 = vst.msk [vmem:[#allocation5] sm:$0xff] %vm633_vm1, %v632_v44 }
 0x37e PF: > { %p774_p7 = scmp.ne.s32.totalorder %s834_s12, 1 }
 0x380   : > { %637 = sbr.rel (%p774_p7) target bundleno = 1038 (0x40e), region = 48 }
 0x385   : > { %v647_v45 = vld [vmem:[#allocation5] sm:$0xff]  ;;  %v851_v46 = vmov 0   ;;  %v852_v47 = vmov 1   ;;  %v643_v49 = vld [vmem:[#allocation3 + $0x10] sm:$0xff]  ;;  %v644_v50 = vld [vmem:[#allocation3] sm:$0xff] }
 0x386   : > { %818 = vset.pattern.permute.xlu0 %v851_v46  ;;  %v645_v51 = vld [vmem:[#allocation3 + $0x18] sm:$0xff]  ;;  %v646_v52 = vld [vmem:[#allocation3 + $0x8] sm:$0xff] }
 0x387   : > { %650 = vperm.xlu0 %818, %v647_v45  }
 0x38b   : > { %819 = vset.pattern.permute.xlu0 %v852_v47 }
 0x38c   : > { %658 = vperm.xlu0 %819, %v647_v45  }
 0x402   : > { %v651_v48 = vpop.permute.xlu0 %650 }
 0x403   : > { %v653_v53 = vmul.f32 %v651_v48, %v643_v49  ;;  %v654_v54 = vmul.f32 %v651_v48, %v644_v50  ;;  %v655_v55 = vmul.f32 %v651_v48, %v645_v51  ;;  %v656_v56 = vmul.f32 %v651_v48, %v646_v52 }
 0x407   : > { %v659_v57 = vpop.permute.xlu0 %658 }
 0x408   : > { %v661_v58 = vadd.f32 %v659_v57, %v653_v53  ;;  %v662_v59 = vadd.f32 %v659_v57, %v654_v54  ;;  %v663_v60 = vadd.f32 %v659_v57, %v655_v55  ;;  %v664_v61 = vadd.f32 %v659_v57, %v656_v56 }
 0x40a   : > { %v665_v62 = vmax.f32 %v661_v58, 0.0  ;;  %v666_v63 = vmax.f32 %v662_v59, 0.0  ;;  %v667_v0 = vmax.f32 %v663_v60, 0.0  ;;  %v668_v1 = vmax.f32 %v664_v61, 0.0 }
 0x40c   : > { %669 = vst [vmem:[%s972_s3] sm:$0xff] %v665_v62  ;;  %670 = vst [vmem:[%s972_s3 + $0x8] sm:$0xff] %v666_v63 }
 0x40d   : > { %775 = vst [vmem:[%s972_s3 + $0x10] sm:$0xff] %v667_v0  ;;  %776 = vst [vmem:[%s972_s3 + $0x18] sm:$0xff] %v668_v1 }
 0x40e PF: > { %s13_s14 = sadd.s32 1, %s842_s14   ;;  %s973_s12 = smov %s838_s13 }
 0x40f   : > { %p10_p8 = scmp.ge.s32.totalorder %s13_s14, 4   ;;  %s974_s13 = smov %s976_s15 }
 0x411   :  { %12 = sbr.rel (!%p10_p8) target bundleno = 2 (0x2), region = 82 }

</bundles_post_ra>
